<compile_context>
chip_gen: v7x
topology: tpu7x:2x2x1
jax: 0.10.0
libtpu: 0.0.40
codegen_flags: <defaults>
</compile_context>

<pallas_src>
import functools

import jax
import jax.numpy as jnp
from jax.experimental import pallas as pl
from jax.experimental.pallas import tpu as pltpu


_VMEM_LIMIT = 48 * 1024 * 1024  # explicit cap: < v7x 64 MiB physical, > v5e 16 MiB default


def _round_up(x, m):
    return (x + m - 1) // m * m


# ----------------------------------------------------------------------------
# Pallas kernels
# ----------------------------------------------------------------------------
def _matmul_kernel(a_ref, w_ref, o_ref):
    # bf16 x bf16 -> f32 accumulate on the MXU; cast at the store.
    o_ref[...] = jnp.dot(a_ref[...], w_ref[...],
                         preferred_element_type=jnp.float32).astype(o_ref.dtype)


def _matmul_bias_kernel(a_ref, w_ref, b_ref, o_ref):
    acc = jnp.dot(a_ref[...], w_ref[...], preferred_element_type=jnp.float32)
    o_ref[...] = (acc + b_ref[...]).astype(o_ref.dtype)


# --- InstanceNorm, fused (whole image fits one block) ------------------------
def _in_fused_relu_kernel(x_ref, o_ref):
    x = x_ref[...].astype(jnp.float32)            # (1, HW, TC)
    inv_hw = 1.0 / x.shape[1]
    mean = jnp.sum(x, axis=1, keepdims=True) * inv_hw
    d = x - mean
    var = jnp.sum(d * d, axis=1, keepdims=True) * inv_hw
    y = d * jax.lax.rsqrt(var + 1e-5)
    o_ref[...] = jnp.maximum(y, 0.0).astype(o_ref.dtype)


def _in_fused_add_kernel(x_ref, r_ref, o_ref):
    x = x_ref[...].astype(jnp.float32)
    inv_hw = 1.0 / x.shape[1]
    mean = jnp.sum(x, axis=1, keepdims=True) * inv_hw
    d = x - mean
    var = jnp.sum(d * d, axis=1, keepdims=True) * inv_hw
    y = d * jax.lax.rsqrt(var + 1e-5)
    o_ref[...] = (y + r_ref[...].astype(jnp.float32)).astype(o_ref.dtype)


# --- InstanceNorm, chunked (large H*W): stats pass + normalize pass ----------
def _in_stats_kernel(x_ref, sum_ref, ssq_ref):
    # Grid: (N, C_tiles, S_chunks); last axis is the reduction ("arbitrary").
    @pl.when(pl.program_id(2) == 0)
    def _():
        sum_ref[...] = jnp.zeros_like(sum_ref)
        ssq_ref[...] = jnp.zeros_like(ssq_ref)
    x = x_ref[...].astype(jnp.float32)            # (1, CH, TC)
    sum_ref[...] += jnp.sum(x, axis=1, keepdims=True)
    ssq_ref[...] += jnp.sum(x * x, axis=1, keepdims=True)


def _in_norm_relu_kernel(x_ref, mean_ref, rstd_ref, o_ref):
    x = x_ref[...].astype(jnp.float32)
    y = (x - mean_ref[...]) * rstd_ref[...]
    o_ref[...] = jnp.maximum(y, 0.0).astype(o_ref.dtype)


def _in_norm_add_kernel(x_ref, r_ref, mean_ref, rstd_ref, o_ref):
    x = x_ref[...].astype(jnp.float32)
    y = (x - mean_ref[...]) * rstd_ref[...]
    o_ref[...] = (y + r_ref[...].astype(jnp.float32)).astype(o_ref.dtype)


# ----------------------------------------------------------------------------
# Pallas wrappers
# ----------------------------------------------------------------------------
def matmul(a, w, b=None, out_dtype=jnp.bfloat16):
    """(M, K) @ (K, N) [+ b] on the MXU.

    Operands are bf16, accumulation is f32, the store casts to `out_dtype`.
    K is used at full extent (no padding copy of `a`); the M axis is tiled
    (TM <= 1024, ragged last block handled by Pallas masking) and marked
    "parallel" so the grid is shardable across TensorCores.
    """
    M, K = a.shape
    Kw, N = w.shape
    assert K == Kw, (K, Kw)
    a = a.astype(jnp.bfloat16)
    w = w.astype(jnp.bfloat16)
    TM = min(1024, _round_up(M, 8))
    grid = (pl.cdiv(M, TM),)

    in_specs = [pl.BlockSpec((TM, K), lambda i: (i, 0)),
                pl.BlockSpec((K, N), lambda i: (0, 0))]
    args = [a, w]
    if b is not None:
        in_specs.append(pl.BlockSpec((1, N), lambda i: (0, 0)))
        args.append(b.reshape(1, N).astype(jnp.float32))
        kernel = _matmul_bias_kernel
    else:
        kernel = _matmul_kernel

    return pl.pallas_call(
        kernel,
        out_shape=jax.ShapeDtypeStruct((M, N), out_dtype),
        grid=grid,
        in_specs=in_specs,
        out_specs=pl.BlockSpec((TM, N), lambda i: (i, 0)),
        compiler_params=pltpu.CompilerParams(
            dimension_semantics=("parallel",),
            vmem_limit_bytes=_VMEM_LIMIT),
    )(*args)


def _pick_chunk(hw, max_chunk):
    """Largest multiple of 8 that divides hw and is <= max_chunk."""
    if hw <= max_chunk:
        return hw
    start = max_chunk - (max_chunk % 8)
    for c in range(start, 7, -8):
        if hw % c == 0:
            return c
    return hw   # fallback: single block (correct, may be large)


def _instance_norm(x, residual, relu, max_chunk):
    """InstanceNorm2d(affine=False) [+ residual | + ReLU], NHWC, bf16 out."""
    n, h, w, c = x.shape
    hw = h * w
    xf = x.reshape(n, hw, c)
    rf = None if residual is None else residual.reshape(n, hw, c)
    tc = c if c <= 128 else 128
    cp = pltpu.CompilerParams(
        dimension_semantics=("parallel", "parallel"),
        vmem_limit_bytes=_VMEM_LIMIT)

    if hw <= max_chunk:
        # Fused one-pass kernel: whole (per-image, per-C-tile) block in VMEM.
        spec = pl.BlockSpec((1, hw, tc), lambda i, j: (i, 0, j))
        if rf is None:
            kernel, args, in_specs = _in_fused_relu_kernel, (xf,), [spec]
        else:
            kernel, args, in_specs = _in_fused_add_kernel, (xf, rf), [spec, spec]
        out = pl.pallas_call(
            kernel,
            out_shape=jax.ShapeDtypeStruct((n, hw, c), jnp.bfloat16),
            grid=(n, c // tc),
            in_specs=in_specs,
            out_specs=spec,
            compiler_params=cp,
        )(*args)
        return out.reshape(n, h, w, c)

    # Chunked path for large H*W: spatial-chunk reduction for the statistics,
    # then an elementwise normalize sweep.  Blocks stay small (VMEM-safe).
    ch = _pick_chunk(hw, max_chunk)
    ns = hw // ch
    xspec = pl.BlockSpec((1, ch, tc), lambda i, j, s: (i, s, j))
    sspec = pl.BlockSpec((1, 1, tc), lambda i, j, s: (i, 0, j))
    cp3 = pltpu.CompilerParams(
        dimension_semantics=("parallel", "parallel", "arbitrary"),
        vmem_limit_bytes=_VMEM_LIMIT)

    sums, ssqs = pl.pallas_call(
        _in_stats_kernel,
        out_shape=(jax.ShapeDtypeStruct((n, 1, c), jnp.float32),
                   jax.ShapeDtypeStruct((n, 1, c), jnp.float32)),
        grid=(n, c // tc, ns),
        in_specs=[xspec],
        out_specs=(sspec, sspec),
        compiler_params=cp3,
    )(xf)

    mean = sums * (1.0 / hw)
    var = ssqs * (1.0 / hw) - mean * mean
    rstd = jax.lax.rsqrt(jnp.maximum(var, 0.0) + 1e-5)

    if rf is None:
        kernel, args = _in_norm_relu_kernel, (xf, mean, rstd)
        in_specs = [xspec, sspec, sspec]
    else:
        kernel, args = _in_norm_add_kernel, (xf, rf, mean, rstd)
        in_specs = [xspec, xspec, sspec, sspec]

    out = pl.pallas_call(
        kernel,
        out_shape=jax.ShapeDtypeStruct((n, hw, c), jnp.bfloat16),
        grid=(n, c // tc, ns),
        in_specs=in_specs,
        out_specs=xspec,
        compiler_params=pltpu.CompilerParams(
            dimension_semantics=("parallel", "parallel", "parallel"),
            vmem_limit_bytes=_VMEM_LIMIT),
    )(*args)
    return out.reshape(n, h, w, c)


def instance_norm_relu(x, max_chunk=4096):
    return _instance_norm(x, None, relu=True, max_chunk=max_chunk)


def instance_norm_add(x, residual, max_chunk=4096):
    return _instance_norm(x, residual, relu=False, max_chunk=max_chunk)


# ----------------------------------------------------------------------------
# Convolution glue (NHWC) around the Pallas matmul kernel
# ----------------------------------------------------------------------------
def _extract_patches_nhwc(x, k, stride, padding, pad_mode):
    """NHWC patch gather in bf16; columns ordered (kh, kw, cin)."""
    x = x.astype(jnp.bfloat16)
    n, _, _, c = x.shape
    if padding > 0:
        mode = 'edge' if pad_mode == 'replicate' else 'constant'
        x = jnp.pad(x, ((0, 0), (padding, padding), (padding, padding), (0, 0)),
                    mode=mode)
    hp, wp = x.shape[1], x.shape[2]
    ho = (hp - k) // stride + 1
    wo = (wp - k) // stride + 1
    taps = [x[:, di:di + stride * ho:stride, dj:dj + stride * wo:stride, :]
            for di in range(k) for dj in range(k)]
    cols = jnp.stack(taps, axis=3)                 # (N, Ho, Wo, k*k, C) bf16
    a = cols.reshape(n * ho * wo, k * k * c)
    # TODO(synk): replace this HBM-materialized gather with a halo-fused Pallas
    # conv (manual DMA row slabs) so the k*k expansion never hits HBM.
    return a, ho, wo


def conv2d_nhwc(x, wm, b=None, *, k, stride=1, padding=0, pad_mode='zeros',
                out_dtype=jnp.bfloat16, cout=None):
    """PyTorch-equivalent Conv2d in NHWC.  wm: (k*k*Cin, Ncols) bf16.

    `Ncols` may be a lane-padded Cout; pass `cout` to slice the true channels.
    """
    n = x.shape[0]
    a, ho, wo = _extract_patches_nhwc(x, k, stride, padding, pad_mode)
    ncols = wm.shape[1]
    out = matmul(a, wm, b, out_dtype=out_dtype).reshape(n, ho, wo, ncols)
    if cout is not None and cout != ncols:
        out = out[..., :cout]
    return out


def conv_transpose2d_nhwc(x, wm, *, cout):
    """ConvTranspose2d(k=3, stride=2, padding=1, output_padding=1) in NHWC.

    Phase (sub-pixel) formulation: one dense matmul of the 2x2-neighbour tap
    matrix (N*H*W, 4*Cin) against a phase-blocked weight (4*Cin, 4*Cout),
    then a depth-to-space interleave.  No zero-inserted buffer, no col2im
    scatter-add passes.  Bias is skipped (cancelled by the following IN).
    """
    n, h, w, cin = x.shape
    x = x.astype(jnp.bfloat16)
    xp = jnp.pad(x, ((0, 0), (0, 1), (0, 1), (0, 0)))      # zero pad bottom/right
    a = jnp.concatenate([xp[:, :h, :w, :],      # t00 = x[m, l]
                         xp[:, :h, 1:, :],      # t01 = x[m, l+1]
                         xp[:, 1:, :w, :],      # t10 = x[m+1, l]
                         xp[:, 1:, 1:, :]],     # t11 = x[m+1, l+1]
                        axis=-1).reshape(n * h * w, 4 * cin)
    out = matmul(a, wm, None, out_dtype=jnp.bfloat16)       # (N*H*W, 4*Cout)
    out = out.reshape(n, h, w, 2, 2, cout)                  # (..., oh%2, ow%2, C)
    out = out.transpose(0, 1, 3, 2, 4, 5).reshape(n, 2 * h, 2 * w, cout)
    return out


# ----------------------------------------------------------------------------
# ResNetGenerator: parameters + forward
# ----------------------------------------------------------------------------
def init_params(key, input_channels=3, output_channels=3, num_res_blocks=9):
    """Weights stored once in matmul layout (bf16); biases f32."""
    params = {}

    def conv_p(name, cin, cout, k, cout_pad=None):
        nonlocal key
        key, k1, k2 = jax.random.split(key, 3)
        fan_in = float(cin * k * k)
        w = jax.random.normal(k1, (cout, cin, k, k), jnp.float32) / jnp.sqrt(fan_in)
        b = 0.01 * jax.random.normal(k2, (cout,), jnp.float32)
        wm = w.transpose(2, 3, 1, 0).reshape(k * k * cin, cout)   # rows: (kh,kw,cin)
        if cout_pad is not None and cout_pad != cout:
            wm = jnp.pad(wm, ((0, 0), (0, cout_pad - cout)))      # lane-dense output
            b = jnp.pad(b, (0, cout_pad - cout))
        params[name + '_wm'] = wm.astype(jnp.bfloat16)
        params[name + '_b'] = b

    def convT_p(name, cin, cout, k=3):
        nonlocal key
        key, k1 = jax.random.split(key)
        fan_in = float(cin * k * k)
        w = jax.random.normal(k1, (cin, cout, k, k), jnp.float32) / jnp.sqrt(fan_in)
        # Phase-blocked matrix: rows [t00|t01|t10|t11]*Cin, cols [p00|p01|p10|p11]*Cout.
        wm = jnp.zeros((4 * cin, 4 * cout), jnp.float32)

        def put(m, r, p, kh, kw):
            return m.at[r * cin:(r + 1) * cin,
                        p * cout:(p + 1) * cout].set(w[:, :, kh, kw])

        wm = put(wm, 0, 0, 1, 1)                       # (even, even)
        wm = put(wm, 0, 1, 1, 2); wm = put(wm, 1, 1, 1, 0)   # (even, odd)
        wm = put(wm, 0, 2, 2, 1); wm = put(wm, 2, 2, 0, 1)   # (odd, even)
        wm = put(wm, 0, 3, 2, 2); wm = put(wm, 1, 3, 2, 0)   # (odd, odd)
        wm = put(wm, 2, 3, 0, 2); wm = put(wm, 3, 3, 0, 0)
        params[name + '_wm'] = wm.astype(jnp.bfloat16)
        # ConvT bias is followed by InstanceNorm -> mathematically cancelled; not stored.

    conv_p('init', input_channels, 64, 7)
    conv_p('down1', 64, 128, 3)
    conv_p('down2', 128, 256, 3)
    for i in range(num_res_blocks):
        conv_p(f'res{i}_c1', 256, 256, 3)
        conv_p(f'res{i}_c2', 256, 256, 3)
    convT_p('up1', 256, 128, 3)
    convT_p('up2', 128, 64, 3)
    conv_p('final', 64, output_channels, 7, cout_pad=128)   # lane-dense final store
    return params


def resnet_generator_forward(params, x, num_res_blocks, output_channels=3):
    # NCHW -> NHWC once; activations stay bf16 until the final conv.
    h = x.transpose(0, 2, 3, 1).astype(jnp.bfloat16)

    # Conv biases followed by InstanceNorm(affine=False) are exactly cancelled
    # by the mean subtraction and are skipped; only 'final' applies its bias.

    # initial: Conv(7x7, replicate pad) + InstanceNorm + ReLU
    h = conv2d_nhwc(h, params['init_wm'], None,
                    k=7, stride=1, padding=3, pad_mode='replicate')
    h = instance_norm_relu(h)
    # downsampling
    h = conv2d_nhwc(h, params['down1_wm'], None, k=3, stride=2, padding=1)
    h = instance_norm_relu(h)
    h = conv2d_nhwc(h, params['down2_wm'], None, k=3, stride=2, padding=1)
    h = instance_norm_relu(h)
    # residual blocks: x + IN(conv(ReLU(IN(conv(x)))))
    for i in range(num_res_blocks):
        r = h
        h = conv2d_nhwc(h, params[f'res{i}_c1_wm'], None, k=3, stride=1, padding=1)
        h = instance_norm_relu(h)
        h = conv2d_nhwc(h, params[f'res{i}_c2_wm'], None, k=3, stride=1, padding=1)
        h = instance_norm_add(h, r)
    # upsampling (transposed convs, phase/sub-pixel formulation)
    h = conv_transpose2d_nhwc(h, params['up1_wm'], cout=128)
    h = instance_norm_relu(h)
    h = conv_transpose2d_nhwc(h, params['up2_wm'], cout=64)
    h = instance_norm_relu(h)
    # final: Conv(7x7, replicate pad) + bias, Identity; f32 output, slice the
    # lane-padded channels back to the true output_channels.
    h = conv2d_nhwc(h, params['final_wm'], params['final_b'],
                    k=7, stride=1, padding=3, pad_mode='replicate',
                    out_dtype=jnp.float32, cout=output_channels)
    return h.transpose(0, 3, 1, 2)   # back to NCHW


# ----------------------------------------------------------------------------
# Test
# ----------------------------------------------------------------------------
if __name__ == "__main__":
    key = jax.random.PRNGKey(0)
    kp, kx, k1, k2 = jax.random.split(key, 4)

    # --- self-check of the InstanceNorm kernels (fused and chunked paths) ---
    def ref_in(xv, res=None, relu=False):
        xf = xv.astype(jnp.float32)
        m = xf.mean(axis=(1, 2), keepdims=True)
        v = xf.var(axis=(1, 2), keepdims=True)
        y = (xf - m) * jax.lax.rsqrt(v + 1e-5)
        if res is not None:
            y = y + res.astype(jnp.float32)
        return jnp.maximum(y, 0.0) if relu else y

    xt = jax.random.normal(k1, (2, 8, 16, 64), jnp.float32).astype(jnp.bfloat16)
    rt = jax.random.normal(k2, (2, 8, 16, 64), jnp.float32).astype(jnp.bfloat16)
    got = instance_norm_relu(xt, max_chunk=32).astype(jnp.float32)      # chunked
    assert float(jnp.max(jnp.abs(got - ref_in(xt, relu=True)))) < 0.1
    got = instance_norm_add(xt, rt, max_chunk=32).astype(jnp.float32)   # chunked
    assert float(jnp.max(jnp.abs(got - ref_in(xt, rt)))) < 0.1
    got = instance_norm_relu(xt).astype(jnp.float32)                    # fused
    assert float(jnp.max(jnp.abs(got - ref_in(xt, relu=True)))) < 0.1

    # --- full generator forward ---
    # Module defaults: input_channels=3, output_channels=3 (channel widths
    # 64/128/256 hard-coded); small spatial size and 2 residual blocks for a
    # fast synthetic test.
    num_res_blocks = 2
    params = init_params(kp, input_channels=3, output_channels=3,
                         num_res_blocks=num_res_blocks)
    x = jax.random.normal(kx, (2, 3, 16, 16), jnp.float32)

    fwd = jax.jit(functools.partial(resnet_generator_forward,
                                    num_res_blocks=num_res_blocks,
                                    output_channels=3))
    y = fwd(params, x)
    jax.block_until_ready(y)
    assert y.shape == (2, 3, 16, 16), y.shape
    assert bool(jnp.all(jnp.isfinite(y)))
    print("KERNEL_OK")
</pallas_src>

<mosaic_0001>
module attributes {stable_mosaic.version = 11 : i64} {
  func.func @_in_stats_kernel(%arg0: i32, %arg1: i32, %arg2: i32, %arg3: memref<1x32x64xbf16, #tpu.memory_space<vmem>>, %arg4: memref<1x1x64xf32, #tpu.memory_space<vmem>>, %arg5: memref<1x1x64xf32, #tpu.memory_space<vmem>>) attributes {dimension_semantics = [#tpu.dimension_semantics<parallel>, #tpu.dimension_semantics<parallel>, #tpu.dimension_semantics<arbitrary>], iteration_bounds = array<i64: 2, 1, 4>, scalar_prefetch = 0 : i64, scratch_operands = 0 : i64, tpu.core_type = #tpu.core_type<tc>, window_params = [{transform_indices = @transform_0, window_bounds = array<i64: 1, 32, 64>}, {transform_indices = @transform_1, window_bounds = array<i64: 1, 1, 64>}, {transform_indices = @transform_2, window_bounds = array<i64: 1, 1, 64>}]} {
    %c0_i32 = arith.constant 0 : i32
    %0 = arith.cmpi eq, %arg2, %c0_i32 : i32
    %1 = arith.extui %0 : i1 to i32
    %c0_i32_0 = arith.constant 0 : i32
    %2 = arith.cmpi ne, %1, %c0_i32_0 : i32
    scf.if %2 {
      %cst_16 = arith.constant 0.000000e+00 : f32
      %16 = vector.broadcast %cst_16 : f32 to vector<1x1x64xf32>
      %c0_17 = arith.constant 0 : index
      %c0_18 = arith.constant 0 : index
      %c0_19 = arith.constant 0 : index
      %17 = vector.load %arg4[%c0_17, %c0_18, %c0_19] : memref<1x1x64xf32, #tpu.memory_space<vmem>>, vector<1x1x64xf32>
      tpu.vector_store %arg4[%c0_17, %c0_18, %c0_19], %16 {strides = array<i32>} : memref<1x1x64xf32, #tpu.memory_space<vmem>>, vector<1x1x64xf32>,
      %cst_20 = arith.constant 0.000000e+00 : f32
      %18 = vector.broadcast %cst_20 : f32 to vector<1x1x64xf32>
      %c0_21 = arith.constant 0 : index
      %c0_22 = arith.constant 0 : index
      %c0_23 = arith.constant 0 : index
      %19 = vector.load %arg5[%c0_21, %c0_22, %c0_23] : memref<1x1x64xf32, #tpu.memory_space<vmem>>, vector<1x1x64xf32>
      tpu.vector_store %arg5[%c0_21, %c0_22, %c0_23], %18 {strides = array<i32>} : memref<1x1x64xf32, #tpu.memory_space<vmem>>, vector<1x1x64xf32>,
    } else {
    }
    %c0 = arith.constant 0 : index
    %c0_1 = arith.constant 0 : index
    %c0_2 = arith.constant 0 : index
    %3 = vector.load %arg3[%c0, %c0_1, %c0_2] : memref<1x32x64xbf16, #tpu.memory_space<vmem>>, vector<1x32x64xbf16>
    %4 = arith.extf %3 : vector<1x32x64xbf16> to vector<1x32x64xf32>
    %c0_3 = arith.constant 0 : index
    %c0_4 = arith.constant 0 : index
    %c0_5 = arith.constant 0 : index
    %5 = vector.load %arg4[%c0_3, %c0_4, %c0_5] : memref<1x1x64xf32, #tpu.memory_space<vmem>>, vector<1x1x64xf32>
    %cst = arith.constant dense<0.000000e+00> : vector<1x64xf32>
    %6 = vector.multi_reduction <add>, %4, %cst [1] : vector<1x32x64xf32> to vector<1x64xf32>
    %7 = vector.shape_cast %6 : vector<1x64xf32> to vector<1x1x64xf32>
    %8 = arith.addf %5, %7 : vector<1x1x64xf32>
    %c0_6 = arith.constant 0 : index
    %c0_7 = arith.constant 0 : index
    %c0_8 = arith.constant 0 : index
    %9 = vector.load %arg4[%c0_6, %c0_7, %c0_8] : memref<1x1x64xf32, #tpu.memory_space<vmem>>, vector<1x1x64xf32>
    tpu.vector_store %arg4[%c0_6, %c0_7, %c0_8], %8 {strides = array<i32>} : memref<1x1x64xf32, #tpu.memory_space<vmem>>, vector<1x1x64xf32>,
    %c0_9 = arith.constant 0 : index
    %c0_10 = arith.constant 0 : index
    %c0_11 = arith.constant 0 : index
    %10 = vector.load %arg5[%c0_9, %c0_10, %c0_11] : memref<1x1x64xf32, #tpu.memory_space<vmem>>, vector<1x1x64xf32>
    %11 = arith.mulf %4, %4 : vector<1x32x64xf32>
    %cst_12 = arith.constant dense<0.000000e+00> : vector<1x64xf32>
    %12 = vector.multi_reduction <add>, %11, %cst_12 [1] : vector<1x32x64xf32> to vector<1x64xf32>
    %13 = vector.shape_cast %12 : vector<1x64xf32> to vector<1x1x64xf32>
    %14 = arith.addf %10, %13 : vector<1x1x64xf32>
    %c0_13 = arith.constant 0 : index
    %c0_14 = arith.constant 0 : index
    %c0_15 = arith.constant 0 : index
    %15 = vector.load %arg5[%c0_13, %c0_14, %c0_15] : memref<1x1x64xf32, #tpu.memory_space<vmem>>, vector<1x1x64xf32>
    tpu.vector_store %arg5[%c0_13, %c0_14, %c0_15], %14 {strides = array<i32>} : memref<1x1x64xf32, #tpu.memory_space<vmem>>, vector<1x1x64xf32>,
    return
  }
  func.func @transform_0(%arg0: i32, %arg1: i32, %arg2: i32) -> (i32, i32, i32) {
    %c0_i32 = arith.constant 0 : i32
    return %arg0, %arg2, %arg1 : i32, i32, i32
  }
  func.func @transform_1(%arg0: i32, %arg1: i32, %arg2: i32) -> (i32, i32, i32) {
    %c0_i32 = arith.constant 0 : i32
    %c0_i32_0 = arith.constant 0 : i32
    return %arg0, %c0_i32, %arg1 : i32, i32, i32
  }
  func.func @transform_2(%arg0: i32, %arg1: i32, %arg2: i32) -> (i32, i32, i32) {
    %c0_i32 = arith.constant 0 : i32
    %c0_i32_0 = arith.constant 0 : i32
    return %arg0, %c0_i32, %arg1 : i32, i32, i32
  }
}

</mosaic_0001>

<bundles_post_ra>
// kernel: tpu_custom_call.1
= control target key start
LH: loop header
LB: loop body
LE: loop exit
PB: predicated region body
PF: predicated region fallthrough
CT: control target
= control target key end

     0   :  { %8 = vsyncpa [#allocation3], 0  ;;  %s829_s0 = inlined_call_operand.vmem [shape: bf16[2,128,64], index: 0, kind: input, shape index: {}]   ;;  %s830_s1 = inlined_call_operand.hbm [shape: f32[2,1,64], index: 1, kind: output, shape index: {0}]   ;;  %s831_s2 = inlined_call_operand.hbm [shape: f32[2,1,64], index: 2, kind: output, shape index: {1}]  }
   0x1   :  { %10 = vsyncpa [#allocation3 + $0x1], 0 }
   0x2   :  { %11 = vsyncpa [#allocation5], 0 }
   0x3   :  { %13 = vsyncpa [#allocation5 + $0x1], 0  ;;  %s639_s9 = smov 0   ;;  %s641_s10 = smov 0  }
   0x4   :  { %s643_s11 = smov 0   ;;  %s645_s12 = smov 0  }
   0x5   :  { %s647_s13 = smov 0   ;;  %s649_s14 = smov 0  }
   0x6   :  { %s651_s15 = smov 0   ;;  %s653_s16 = smov 0  }
   0x7 LB: > { %s394_s17 = sadd.s32 4294967295, %s619_s16   ;;  %s395_s18 = sadd.s32 4294967294, %s619_s16   ;;  %s619_s16 = sphi %s653_s16, %s19_s16   ;;  %s615_s15 = sphi %s651_s15, %s840_s15   ;;  %s611_s14 = sphi %s649_s14, %s839_s14   ;;  %s607_s13 = sphi %s647_s13, %s838_s13   ;;  %s603_s12 = sphi %s645_s12, %s837_s12   ;;  %s599_s11 = sphi %s643_s11, %s836_s11   ;;  %s595_s10 = sphi %s641_s10, %s835_s10   ;;  %s591_s9 = sphi %s639_s9, %s834_s9  }
   0x8   : > { %s31_s19 = sadd.s32 1, %s611_s14  ;;  %s38_s20 = sadd.s32 1, %s615_s15 }
   0x9   : > { %p32_p0 = scmp.ge.s32.totalorder %s31_s19, 4  ;;  %p87_p1 = scmp.ne.s32.totalorder %s599_s11, %s595_s10 }
   0xa   : > { %p88_p2 = scmp.eq.s32.totalorder %s394_s17, 7  ;;  %p93_p4 = scmp.ne.s32.totalorder %s595_s10, %s591_s9 }
   0xb   : > { %s842_s19 = smov (%p32_p0, %s31_s19), 0  ;;  %s844_s20 = smov (!%p32_p0, %s38_s20), %s615_s15 }
   0xc   : > { %p688_p3 = por %p88_p2, %p87_p1  ;;  %p40_p5 = scmp.ge.s32.totalorder %s844_s20, 2 }
   0xd   : > { %p94_p6 = scmp.eq.s32.totalorder %s395_s18, 7  ;;  %p398_p7 = scmp.ge.s32.totalorder %s619_s16, 1 }
   0xe   : > { %p156_p8 = scmp.lt.s32.totalorder %s619_s16, 9  ;;  %s846_s20 = smov (%p40_p5, %s844_s20), 0 }
   0xf   : > { %p698_p9 = por %p94_p6, %p93_p4  ;;  %s72_s23 = ssub.s32 %s615_s15, %s846_s20 }
  0x10   : > { %p157_p10 = pnand %p398_p7, %p156_p8  ;;  %s77_s24 = sadd.s32 1, %s599_s11 }
  0x11   : > { %p75_p11 = scmp.eq.s32.totalorder %s72_s23, 0  ;;  %s709_s26 = sand.u32 (!%p157_p10), 1, %s595_s10  }
  0x12   : > { %160 = sbr.rel (%p157_p10) target bundleno = 95 (0x5f), region = 24  ;;  %s399_s27 = sshll.u32 (!%p157_p10), %s603_s12, 2 }
  0x13   : > { %s706_s25 = scalar_select %p75_p11, %s599_s11, %s77_s24  }
  0x14   : > { %p189_p12 = scmp.lt.s32.totalorder (!%p157_p10), %s607_s13, 1  ;;  %p191_p13 = scmp.lt.s32.totalorder (!%p157_p10), %s399_s27, 15 }
  0x15   : > { %s718_s7 = scalar_lea.vmem (!%p157_p10), [#allocation2], %s709_s26  ;;  %s721_s8 = scalar_lea.vmem (!%p157_p10), [#allocation4], %s709_s26 }
  0x16   : > { %p402_p0 = scmp.ne.s32.totalorder (!%p157_p10), %s603_s12, 0 }
  0x19   : > { %s190_s28 = scalar_select %p189_p12, %s607_s13, 1 }
  0x1a   : > { %s848_s27 = smov (!%p191_p13, %s399_s27), 15  ;;  %204 = sbr.rel (%p402_p0) target bundleno = 33 (0x21), region = 28 }
  0x1b   : > { %s400_s29 = sshll.u32 %s190_s28, 4  ;;  %vm205_vm0 = vcmask (!%p402_p0), 516096   ;;  %v621_v0 = vmov (!%p402_p0), 0.0  }
  0x1c   : > { %s197_s30 = sadd.s32 %s400_s29, %s848_s27  ;;  %206 = vst.msk [vmem:[%s718_s7] sm:$0x1] (!%p402_p0), %vm205_vm0, %v621_v0  ;;  %207 = vst.msk [vmem:[%s721_s8] sm:$0x1] (!%p402_p0), %vm205_vm0, %v621_v0 }
  0x1d   : > { %s401_s3 = sshll.u32 %s197_s30, 2 }
  0x1e   : > { %s199_s6 = scalar_lea.vmem %s829_s0, %s401_s3 }
  0x21 PF: > { %v408_v1 = vld [vmem:[%s199_s6] sm:$0xff]   ;;  %v415_v2 = vld [vmem:[%s199_s6 + $0x8] sm:$0xff]   ;;  %vm217_vm1 = vcmask 523264   ;;  %s403_s12 = sshll.u32 %s607_s13, 4  ;;  %s272_s17 = sshll.u32 %s718_s7, 4  ;;  %vm232_vm2 = vcmask 516096   ;;  %s744_s17 = int_to_ptr.vmem [resolvable:$true] %s272_s17 }
  0x22   : > { %v409_v3 = vunpack.c.l.bf16 %v408_v1  ;;  %v410_v4 = vunpack.c.h.bf16 %v408_v1  ;;  %v413_v5 = vunpack.c.l.bf16 %v415_v2  ;;  %v414_v6 = vunpack.c.h.bf16 %v415_v2  ;;  %s286_s18 = sshll.u32 %s721_s8, 4  ;;  %s742_s27 = scalar_lea.hbm %s830_s1, %s403_s12  ;;  %s753_s18 = int_to_ptr.vmem [resolvable:$true] %s286_s18 }
  0x23   : > { %v216_v33 = vld [vmem:[%s718_s7] sm:$0x1]  ;;  %s751_s29 = scalar_lea.hbm %s831_s2, %s403_s12  ;;  %s255_s30 = scalar_lea.sflag [#allocation3], %s709_s26 }
  0x24   : > { %v218_v7 = vsel %vm217_vm1, %v409_v3, 0.0  ;;  %v219_v8 = vsel %vm217_vm1, %v410_v4, 0.0  ;;  %v221_v9 = vsel %vm217_vm1, %v413_v5, 0.0  ;;  %v235_v11 = vmul.f32 %v409_v3, %v409_v3  ;;  %v234_v38 = vld [vmem:[%s721_s8] sm:$0x1]  ;;  %s493_s3 = scalar_lea.vmem %s744_s17, 16 }
  0x25   : > { %v220_v10 = vadd.f32 %v219_v8, %v218_v7  ;;  %v236_v12 = vmul.f32 %v410_v4, %v410_v4  ;;  %v237_v13 = vmul.f32 %v413_v5, %v413_v5  ;;  %v223_v14 = vsel %vm217_vm1, %v414_v6, 0.0  ;;  %p494_p1 = scmp.ne.s32.totalorder %s744_s17, %s493_s3  ;;  %s622_s4 = smov [#allocation2]  }
  0x26   : > { %v238_v15 = vmul.f32 %v414_v6, %v414_v6  ;;  %v239_v17 = vsel %vm217_vm1, %v235_v11, 0.0  ;;  %s497_s5 = sshll.u32 %s622_s4, 4  ;;  %s498_s5 = int_to_ptr.vmem [resolvable:$false] %s497_s5 }
  0x27   : > { %v222_v16 = vadd.f32 %v221_v9, %v220_v10  ;;  %v240_v18 = vsel %vm217_vm1, %v236_v12, 0.0  ;;  %v242_v19 = vsel %vm217_vm1, %v237_v13, 0.0  ;;  %p495_p2 = pnand %p494_p1, %p688_p3  ;;  %s499_s6 = scalar_lea.vmem %s498_s5, 32 }
  0x28   : > { %v241_v20 = vadd.f32 %v240_v18, %v239_v17  ;;  %v244_v22 = vsel %vm217_vm1, %v238_v15, 0.0  ;;  %p500_p5 = scmp.lt.s32.totalorder %s744_s17, %s498_s5  ;;  %p501_p6 = scmp.lt.s32.totalorder %s499_s6, %s493_s3 }
  0x29   : > { %v224_v21 = vadd.f32 %v223_v14, %v222_v16  ;;  %p496_p4 = pneg %p495_p2 }
  0x2a   : > { %v243_v23 = vadd.f32 %v242_v19, %v241_v20  ;;  %p502_p7 = por %p501_p6, %p500_p5 }
  0x2b   : > { %v225_v24 = vrot.slane %v224_v21, 4 }
  0x2c   : > { %v245_v25 = vadd.f32 %v244_v22, %v243_v23  ;;  %p503_p8 = pnand %p502_p7, %p496_p4 }
  0x2d   : > { %v226_v26 = vadd.f32 %v225_v24, %v224_v21 }
  0x2e   : > { %v246_v27 = vrot.slane %v245_v25, 4 }
  0x2f   : > { %v227_v28 = vrot.slane %v226_v26, 2 }
  0x30   : > { %v247_v29 = vadd.f32 %v246_v27, %v245_v25 }
  0x31   : > { %v228_v30 = vadd.f32 %v227_v28, %v226_v26 }
  0x32   : > { %v248_v31 = vrot.slane %v247_v29, 2 }
  0x33   : > { %v229_v32 = vrot.slane %v228_v30, 1 }
  0x34   : > { %v249_v34 = vadd.f32 %v248_v31, %v247_v29 }
  0x35   : > { %v230_v35 = vadd.f32 %v229_v32, %v228_v30 }
  0x36   : > { %v250_v36 = vrot.slane %v249_v34, 1 }
  0x37   : > { %v231_v37 = vadd.f32 %v230_v35, %v216_v33 }
  0x38   : > { %v251_v39 = vadd.f32 %v250_v36, %v249_v34 }
  0x39   : > { %233 = vst.msk [vmem:[%s718_s7] sm:$0x1] %vm232_vm2, %v231_v37 }
  0x3a   : > { %v252_v40 = vadd.f32 %v251_v39, %v234_v38 }
  0x3b   : > { %506 = shalt.err (!%p503_p8)
}
  0x3c   : > { %s507_s7 = scalar_lea.hbm %s742_s27, 16  ;;  %s511_s24 = scalar_lea.hbm %s830_s1, 32 }
  0x3d   : > { %p508_p10 = scmp.ne.s32.totalorder %s742_s27, %s507_s7  ;;  %p512_p13 = scmp.lt.u32.totalorder %s742_s27, %s830_s1 }
  0x3e   : > { %p513_p0 = scmp.lt.u32.totalorder %s511_s24, %s507_s7  ;;  %p515_p2 = scmp.lt.u32.totalorder %s507_s7, %s742_s27 }
  0x3f   : > { %p509_p11 = pnand %p508_p10, %p688_p3 }
  0x40   : > { %p514_p1 = por %p513_p0, %p512_p13 }
  0x41   : > { %p510_p12 = pneg %p509_p11 }
  0x42   : > { %p516_p4 = por %p515_p2, %p514_p1 }
  0x44   : > { %p517_p5 = pnand %p516_p4, %p510_p12 }
  0x46   : > { %520 = shalt.err (!%p517_p5)
}
  0x47   : > { %416 = dma.vmem_to_hbm [thread:$0]  (%p688_p3), %s744_s17, 16, %s742_s27, %s255_s30   ;;  %253 = vst.msk [vmem:[%s721_s8] sm:$0x1] %vm232_vm2, %v252_v40 }
  0x48   : > { %s259_s3 = scalar_lea.sflag [#allocation5], %s709_s26  ;;  %s521_s4 = scalar_lea.vmem %s753_s18, 16 }
  0x49   : > { %p522_p6 = scmp.ne.s32.totalorder %s753_s18, %s521_s4  ;;  %s623_s5 = smov [#allocation4]  }
  0x4a   : > { %s525_s6 = sshll.u32 %s623_s5, 4  ;;  %s526_s6 = int_to_ptr.vmem [resolvable:$false] %s525_s6 }
  0x4b   : > { %p523_p7 = pnand %p522_p6, %p688_p3  ;;  %s527_s7 = scalar_lea.vmem %s526_s6, 32 }
  0x4c   : > { %p528_p10 = scmp.lt.s32.totalorder %s753_s18, %s526_s6  ;;  %p529_p11 = scmp.lt.s32.totalorder %s527_s7, %s521_s4 }
  0x4d   : > { %p524_p8 = pneg %p523_p7 }
  0x4e   : > { %p530_p12 = por %p529_p11, %p528_p10 }
  0x50   : > { %p531_p13 = pnand %p530_p12, %p524_p8 }
  0x52   : > { %534 = shalt.err (!%p531_p13)
}
  0x53   : > { %s535_s26 = scalar_lea.hbm %s751_s29, 16  ;;  %s539_s27 = scalar_lea.hbm %s831_s2, 32 }
  0x54   : > { %p536_p0 = scmp.ne.s32.totalorder %s751_s29, %s535_s26  ;;  %p540_p4 = scmp.lt.u32.totalorder %s751_s29, %s831_s2 }
  0x55   : > { %p541_p5 = scmp.lt.u32.totalorder %s539_s27, %s535_s26  ;;  %p543_p7 = scmp.lt.u32.totalorder %s535_s26, %s751_s29 }
  0x56   : > { %p537_p1 = pnand %p536_p0, %p688_p3 }
  0x57   : > { %p542_p6 = por %p541_p5, %p540_p4 }
  0x58   : > { %p538_p2 = pneg %p537_p1 }
  0x59   : > { %p544_p8 = por %p543_p7, %p542_p6 }
  0x5b   : > { %p545_p10 = pnand %p544_p8, %p538_p2 }
  0x5d   : > { %548 = shalt.err (!%p545_p10)
}
  0x5e   : > { %417 = dma.vmem_to_hbm [thread:$0]  (%p688_p3), %s753_s18, 16, %s751_s29, %s259_s3  }
  0x5f PF: > { %p427_p11 = scmp.ge.s32.totalorder %s619_s16, 2  ;;  %s298_s23 = sand.u32 1, %s591_s9  }
  0x60   : > { %s299_s24 = scalar_lea.sflag [#allocation3], %s298_s23 }
  0x61   : > { %p421_p12 = pnand %p427_p11, %p698_p9 }
  0x63   : > { %582 = dma.done.wait (!%p421_p12), %s299_s24, 16  }
  0x64   : > { %584 = vsyncadd (!%p421_p12), %s299_s24, 4294967280  ;;  %s307_s13 = scalar_lea.sflag [#allocation5], %s298_s23 }
  0x65   : > { %586 = dma.done.wait (!%p421_p12), %s307_s13, 16  }
  0x66   : > { %588 = vsyncadd (!%p421_p12), %s307_s13, 4294967280  ;;  %s19_s16 = sadd.s32 1, %s619_s16   ;;  %s834_s9 = smov %s595_s10 }
  0x67   : > { %p16_p13 = scmp.ge.s32.totalorder %s19_s16, 10   ;;  %s835_s10 = smov %s599_s11 }
  0x68   : > { %s836_s11 = smov %s706_s25  ;;  %s837_s12 = smov %s611_s14 }
  0x69   : > { %s838_s13 = smov %s615_s15  ;;  %s839_s14 = smov %s842_s19 }
  0x6a   : > { %s840_s15 = smov %s846_s20  ;;  %18 = sbr.rel (!%p16_p13) target bundleno = 7 (0x7), region = 80 }
  0x71   :  { %311 = vsyncpa [#allocation3], 1 }
  0x72   :  { %313 = vsyncpa [#allocation3 + $0x1], 1 }
  0x73   :  { %314 = vsyncpa [#allocation5], 1 }
  0x74   :  { %316 = vsyncpa [#allocation5 + $0x1], 1 }

</bundles_post_ra>
